<compile_context>
chip_gen: v7x
topology: tpu7x:2x2x1
jax: 0.10.0
libtpu: 0.0.40
codegen_flags: <defaults>
</compile_context>

<pallas_src>
import math

import jax
import jax.numpy as jnp
from jax import lax
from jax.experimental import pallas as pl
from jax.experimental.pallas import tpu as pltpu


# Contract dim 1 of both operands: (M, K) x (N, K) -> (M, N).  No transpose.
_DN = (((1,), (1,)), ((), ()))


# ---------------------------------------------------------------------------
# Kernels
# ---------------------------------------------------------------------------
def _noisy_factored_kernel(x_ref, wmu_ref, wsig_ref, ein_ref, eout_ref, b_ref,
                           o_ref, acc_ref):
    """Default training path. weight_epsilon = outer(eps_out, eps_in), so
    y = x @ wmu.T + eps_out * ((x * eps_in) @ wsig.T) + b_eff."""
    k = pl.program_id(2)

    @pl.when(k == 0)
    def _():
        acc_ref[...] = jnp.zeros_like(acc_ref)

    x = x_ref[...]                                                # (tm, tk) bf16
    # VPU math in f32 (v5e has no bf16 VALUs); only the MXU sees bf16.
    xe = (x.astype(jnp.float32) * ein_ref[...]).astype(x.dtype)   # (tm, tk)
    acc_ref[...] += (
        lax.dot_general(x, wmu_ref[...], dimension_numbers=_DN,
                        preferred_element_type=jnp.float32)
        + eout_ref[...] * lax.dot_general(xe, wsig_ref[...],
                                          dimension_numbers=_DN,
                                          preferred_element_type=jnp.float32))

    @pl.when(k == pl.num_programs(2) - 1)
    def _():
        o_ref[...] = (acc_ref[...] + b_ref[...]).astype(o_ref.dtype)


def _noisy_materialized_kernel(x_ref, wmu_ref, wsig_ref, weps_ref, b_ref,
                               o_ref, acc_ref):
    """Fallback training path with a fully materialized (out, in) epsilon."""
    k = pl.program_id(2)

    @pl.when(k == 0)
    def _():
        acc_ref[...] = jnp.zeros_like(acc_ref)

    # Noise combine in f32 on the VPU, downcast once for the MXU.
    w = (wmu_ref[...].astype(jnp.float32)
         + wsig_ref[...].astype(jnp.float32) * weps_ref[...].astype(jnp.float32))
    acc_ref[...] += lax.dot_general(x_ref[...], w.astype(x_ref.dtype),
                                    dimension_numbers=_DN,
                                    preferred_element_type=jnp.float32)

    @pl.when(k == pl.num_programs(2) - 1)
    def _():
        o_ref[...] = (acc_ref[...] + b_ref[...]).astype(o_ref.dtype)


def _linear_eval_kernel(x_ref, wmu_ref, b_ref, o_ref, acc_ref):
    """Eval path: x @ weight_mu.T + bias_mu (single weight stream)."""
    k = pl.program_id(2)

    @pl.when(k == 0)
    def _():
        acc_ref[...] = jnp.zeros_like(acc_ref)

    acc_ref[...] += lax.dot_general(x_ref[...], wmu_ref[...],
                                    dimension_numbers=_DN,
                                    preferred_element_type=jnp.float32)

    @pl.when(k == pl.num_programs(2) - 1)
    def _():
        o_ref[...] = (acc_ref[...] + b_ref[...]).astype(o_ref.dtype)


# ---------------------------------------------------------------------------
# Padding / tiling helpers
# ---------------------------------------------------------------------------
def _round_up(n, m):
    return ((n + m - 1) // m) * m


def _pad_to(a, shape):
    pads = [(0, t - s) for s, t in zip(a.shape, shape)]
    if any(p[1] for p in pads):
        a = jnp.pad(a, pads)
    return a


def _largest_tile(dim, preferred, granularity):
    """Largest multiple of `granularity` <= preferred that divides `dim`
    (dim is itself a multiple of granularity)."""
    t = min(preferred, dim)
    t = max(granularity, (t // granularity) * granularity)
    while dim % t:
        t -= granularity
    return t


def _pick_tiles(B, Np, Kp, itemsize, tm=None, tn=None, tk=None):
    sub = 16 if itemsize < 4 else 8           # bf16 packs 2 rows / sublane
    if tm is None:
        # tm=256 fills the 2x256x256 MXU on v6e/v7x and halves weight re-DMA
        # across the M grid; small RL batches take one padded block.
        tm = 256 if B >= 256 else _round_up(B, sub)
    Mp = _round_up(B, tm)
    if tn is None:
        tn = _largest_tile(Np, 256, 128)
        # v7x megacore: guarantee >= 2 blocks on a "parallel" axis when we can,
        # otherwise the second TensorCore idles for grid (1, 1, K).
        if Mp // tm == 1 and Np // tn == 1 and Np % 256 == 0:
            tn = Np // 2
    else:
        assert Np % tn == 0
    if tk is None:
        # Grow K tile toward full K: kills per-grid-step overhead and, for
        # typical NoisyNet layer widths, removes the K-accumulation loop.
        tk = _largest_tile(Kp, 2048, 128)
    else:
        assert Kp % tk == 0
    return tm, tn, tk, Mp


def _vmem_limit_bytes(tm, tn, tk, itemsize, n_weight_streams):
    needed = 2 * tm * tk * itemsize                       # x, double-buffered
    needed += 2 * n_weight_streams * tn * tk * itemsize   # weight streams
    needed += 2 * (tk + 3 * tn) * 4                       # (1, tk)/(1, tn) vecs
    needed += 2 * tm * tn * 4                             # output tile
    needed += tm * tn * 4                                 # f32 accumulator
    # Explicit scoped limit (v5e default is only 16 MiB); cap well under v7x's
    # 64 MiB physical VMEM.
    return min(max(int(needed * 1.25) + (2 << 20), 32 << 20), 56 << 20)


# ---------------------------------------------------------------------------
# Parameter preparation (do ONCE at init / reset_noise, not per forward)
# ---------------------------------------------------------------------------
def prepare_noisy_linear2(p, compute_dtype=jnp.bfloat16):
    """Pad params once to lane-aligned shapes, cast weight streams to the MXU
    compute dtype, and pre-combine the noisy bias."""
    N, K = p["weight_mu"].shape
    Np, Kp = _round_up(N, 128), _round_up(K, 128)
    b_eff = p["bias_mu"] + p["bias_sigma"] * p["bias_epsilon"]      # f32, tiny
    prep = dict(
        in_features=K, out_features=N, Np=Np, Kp=Kp, compute_dtype=compute_dtype,
        weight_mu=_pad_to(p["weight_mu"], (Np, Kp)).astype(compute_dtype),
        weight_sigma=_pad_to(p["weight_sigma"], (Np, Kp)).astype(compute_dtype),
        weight_epsilon=_pad_to(p["weight_epsilon"], (Np, Kp)).astype(compute_dtype),
        bias_mu=_pad_to(p["bias_mu"].reshape(1, N), (1, Np)).astype(jnp.float32),
        bias_eff=_pad_to(b_eff.reshape(1, N), (1, Np)).astype(jnp.float32),
    )
    if "eps_in" in p and "eps_out" in p:
        prep["eps_in"] = _pad_to(p["eps_in"].reshape(1, K), (1, Kp)).astype(jnp.float32)
        prep["eps_out"] = _pad_to(p["eps_out"].reshape(1, N), (1, Np)).astype(jnp.float32)
    return prep


# ---------------------------------------------------------------------------
# Forward wrapper
# ---------------------------------------------------------------------------
def noisy_linear2_forward(x, prep, training=True, prefer_factored=True,
                          tm=None, tn=None, tk=None):
    B, K = x.shape
    assert K == prep["in_features"]
    N, Np, Kp = prep["out_features"], prep["Np"], prep["Kp"]
    cdt = prep["compute_dtype"]
    itemsize = jnp.dtype(cdt).itemsize

    tm, tn, tk, Mp = _pick_tiles(B, Np, Kp, itemsize, tm, tn, tk)
    grid = (Mp // tm, Np // tn, Kp // tk)

    # Only the activation is padded / cast per call (weights are pre-padded).
    xp = _pad_to(x, (Mp, Kp)).astype(cdt)

    x_spec = pl.BlockSpec((tm, tk), lambda i, j, k: (i, k))
    w_spec = pl.BlockSpec((tn, tk), lambda i, j, k: (j, k))
    bn_spec = pl.BlockSpec((1, tn), lambda i, j, k: (0, j))
    bk_spec = pl.BlockSpec((1, tk), lambda i, j, k: (0, k))
    o_spec = pl.BlockSpec((tm, tn), lambda i, j, k: (i, j))

    if not training:
        n_w, kernel = 1, _linear_eval_kernel
        in_specs = [x_spec, w_spec, bn_spec]
        args = (xp, prep["weight_mu"], prep["bias_mu"])
    elif prefer_factored and "eps_in" in prep:
        n_w, kernel = 2, _noisy_factored_kernel
        in_specs = [x_spec, w_spec, w_spec, bk_spec, bn_spec, bn_spec]
        args = (xp, prep["weight_mu"], prep["weight_sigma"],
                prep["eps_in"], prep["eps_out"], prep["bias_eff"])
    else:
        n_w, kernel = 3, _noisy_materialized_kernel
        in_specs = [x_spec, w_spec, w_spec, w_spec, bn_spec]
        args = (xp, prep["weight_mu"], prep["weight_sigma"],
                prep["weight_epsilon"], prep["bias_eff"])

    out = pl.pallas_call(
        kernel,
        out_shape=jax.ShapeDtypeStruct((Mp, Np), x.dtype),
        grid_spec=pltpu.PrefetchScalarGridSpec(
            num_scalar_prefetch=0,
            grid=grid,
            in_specs=in_specs,
            out_specs=o_spec,
            scratch_shapes=[pltpu.VMEM((tm, tn), jnp.float32)]),
        compiler_params=pltpu.CompilerParams(
            dimension_semantics=("parallel", "parallel", "arbitrary"),
            vmem_limit_bytes=_vmem_limit_bytes(tm, tn, tk, itemsize, n_w)),
    )(*args)

    if (Mp, Np) != (B, N):
        out = out[:B, :N]
    return out


# ---------------------------------------------------------------------------
# Deterministic parameter / noise construction mirroring the module's __init__
# ---------------------------------------------------------------------------
def _scale_noise(key, size):
    x = jax.random.normal(key, (size,), dtype=jnp.float32)
    return jnp.sign(x) * jnp.sqrt(jnp.abs(x))


def init_noisy_linear2(key, in_features, out_features, std_init=0.4):
    k_wmu, k_bmu, k_ein, k_eout, k_beps = jax.random.split(key, 5)
    mu_range = 1.0 / math.sqrt(in_features)

    weight_mu = jax.random.uniform(
        k_wmu, (out_features, in_features), jnp.float32, -mu_range, mu_range)
    weight_sigma = jnp.full((out_features, in_features),
                            std_init / math.sqrt(in_features), jnp.float32)
    bias_mu = jax.random.uniform(
        k_bmu, (out_features,), jnp.float32, -mu_range, mu_range)
    bias_sigma = jnp.full((out_features,),
                          std_init / math.sqrt(out_features), jnp.float32)

    eps_in = _scale_noise(k_ein, in_features)
    eps_out = _scale_noise(k_eout, out_features)
    weight_epsilon = jnp.outer(eps_out, eps_in)          # ger(eps_out, eps_in)
    bias_epsilon = _scale_noise(k_beps, out_features)

    return dict(weight_mu=weight_mu, weight_sigma=weight_sigma,
                weight_epsilon=weight_epsilon, bias_mu=bias_mu,
                bias_sigma=bias_sigma, bias_epsilon=bias_epsilon,
                eps_in=eps_in, eps_out=eps_out)


# ---------------------------------------------------------------------------
# Self-test
# ---------------------------------------------------------------------------
def _run_checks(key, batch, in_features, out_features, tk=None):
    k_params, k_x = jax.random.split(key)
    p = init_noisy_linear2(k_params, in_features, out_features)
    x = jax.random.normal(k_x, (batch, in_features), dtype=jnp.float32)
    prep = prepare_noisy_linear2(p)

    bf = lambda a: a.astype(jnp.bfloat16).astype(jnp.float32)
    xb = bf(x)
    wmu_b, wsig_b, weps_b = bf(p["weight_mu"]), bf(p["weight_sigma"]), bf(p["weight_epsilon"])
    b_eff = p["bias_mu"] + p["bias_sigma"] * p["bias_epsilon"]

    # PyTorch-semantics f32 references (loose tolerance: operands stored bf16).
    y_train_f32 = x @ (p["weight_mu"] + p["weight_sigma"] * p["weight_epsilon"]).T + b_eff
    y_eval_f32 = x @ p["weight_mu"].T + p["bias_mu"]

    # bf16-rounding-aware references (tight tolerance).
    xe_b = bf(xb * p["eps_in"][None, :])
    y_fact_ref = xb @ wmu_b.T + p["eps_out"][None, :] * (xe_b @ wsig_b.T) + b_eff
    y_mat_ref = xb @ bf(wmu_b + wsig_b * weps_b).T + b_eff
    y_eval_ref = xb @ wmu_b.T + p["bias_mu"][None, :]

    # Factored training path (default).
    y_fact = noisy_linear2_forward(x, prep, training=True, tk=tk)
    jax.block_until_ready(y_fact)
    assert y_fact.shape == (batch, out_features)
    assert jnp.allclose(y_fact, y_fact_ref, atol=2e-3, rtol=2e-3), "factored vs bf16 ref"
    assert jnp.allclose(y_fact, y_train_f32, atol=1e-1, rtol=1e-1), "factored vs f32 ref"

    # Materialized-epsilon fallback.
    y_mat = noisy_linear2_forward(x, prep, training=True, prefer_factored=False, tk=tk)
    jax.block_until_ready(y_mat)
    assert y_mat.shape == (batch, out_features)
    assert jnp.allclose(y_mat, y_mat_ref, atol=2e-3, rtol=2e-3), "materialized vs bf16 ref"
    assert jnp.allclose(y_mat, y_train_f32, atol=1e-1, rtol=1e-1), "materialized vs f32 ref"

    # Eval path (mu only, single weight stream).
    y_eval = noisy_linear2_forward(x, prep, training=False, tk=tk)
    jax.block_until_ready(y_eval)
    assert y_eval.shape == (batch, out_features)
    assert jnp.allclose(y_eval, y_eval_ref, atol=2e-3, rtol=2e-3), "eval vs bf16 ref"
    assert jnp.allclose(y_eval, y_eval_f32, atol=1e-1, rtol=1e-1), "eval vs f32 ref"


if __name__ == "__main__":
    key = jax.random.PRNGKey(0)
    k_small, k_med = jax.random.split(key)

    # Small shape consistent with the module (single grid step, padded tiles).
    _run_checks(k_small, batch=8, in_features=32, out_features=64)

    # Medium shape exercising a multi-block (M, N, K) grid: N split into 2
    # parallel blocks (megacore heuristic) and K accumulation via tk override.
    _run_checks(k_med, batch=64, in_features=384, out_features=256, tk=128)

    print("KERNEL_OK")
</pallas_src>

<mosaic_0001>
module attributes {stable_mosaic.version = 11 : i64} {
  func.func @_noisy_factored_kernel(%arg0: i32, %arg1: i32, %arg2: i32, %arg3: memref<16x128xbf16, #tpu.memory_space<vmem>>, %arg4: memref<128x128xbf16, #tpu.memory_space<vmem>>, %arg5: memref<128x128xbf16, #tpu.memory_space<vmem>>, %arg6: memref<1x128xf32, #tpu.memory_space<vmem>>, %arg7: memref<1x128xf32, #tpu.memory_space<vmem>>, %arg8: memref<1x128xf32, #tpu.memory_space<vmem>>, %arg9: memref<16x128xf32, #tpu.memory_space<vmem>>, %arg10: memref<16x128xf32, #tpu.memory_space<vmem>>) attributes {dimension_semantics = [#tpu.dimension_semantics<parallel>, #tpu.dimension_semantics<parallel>, #tpu.dimension_semantics<arbitrary>], iteration_bounds = array<i64: 1, 1, 1>, scalar_prefetch = 0 : i64, scratch_operands = 1 : i64, tpu.core_type = #tpu.core_type<tc>, window_params = [{transform_indices = @transform_0, window_bounds = array<i64: 16, 128>}, {transform_indices = @transform_1, window_bounds = array<i64: 128, 128>}, {transform_indices = @transform_2, window_bounds = array<i64: 128, 128>}, {transform_indices = @transform_3, window_bounds = array<i64: 1, 128>}, {transform_indices = @transform_4, window_bounds = array<i64: 1, 128>}, {transform_indices = @transform_5, window_bounds = array<i64: 1, 128>}, {transform_indices = @transform_6, window_bounds = array<i64: 16, 128>}]} {
    %c0_i32 = arith.constant 0 : i32
    %0 = arith.cmpi eq, %arg2, %c0_i32 : i32
    %1 = arith.extui %0 : i1 to i32
    %c0_i32_0 = arith.constant 0 : i32
    %2 = arith.cmpi ne, %1, %c0_i32_0 : i32
    scf.if %2 {
      %cst_17 = arith.constant 0.000000e+00 : f32
      %23 = vector.broadcast %cst_17 : f32 to vector<16x128xf32>
      %c0_18 = arith.constant 0 : index
      %c0_19 = arith.constant 0 : index
      %24 = vector.load %arg10[%c0_18, %c0_19] : memref<16x128xf32, #tpu.memory_space<vmem>>, vector<16x128xf32>
      tpu.vector_store %arg10[%c0_18, %c0_19], %23 {strides = array<i32>} : memref<16x128xf32, #tpu.memory_space<vmem>>, vector<16x128xf32>,
    } else {
    }
    %c0 = arith.constant 0 : index
    %c0_1 = arith.constant 0 : index
    %3 = vector.load %arg3[%c0, %c0_1] : memref<16x128xbf16, #tpu.memory_space<vmem>>, vector<16x128xbf16>
    %4 = arith.extf %3 : vector<16x128xbf16> to vector<16x128xf32>
    %c0_2 = arith.constant 0 : index
    %c0_3 = arith.constant 0 : index
    %5 = vector.load %arg6[%c0_2, %c0_3] : memref<1x128xf32, #tpu.memory_space<vmem>>, vector<1x128xf32>
    %6 = vector.broadcast %5 : vector<1x128xf32> to vector<16x128xf32>
    %7 = arith.mulf %4, %6 : vector<16x128xf32>
    %8 = arith.truncf %7 : vector<16x128xf32> to vector<16x128xbf16>
    %c0_4 = arith.constant 0 : index
    %c0_5 = arith.constant 0 : index
    %9 = vector.load %arg10[%c0_4, %c0_5] : memref<16x128xf32, #tpu.memory_space<vmem>>, vector<16x128xf32>
    %c0_6 = arith.constant 0 : index
    %c0_7 = arith.constant 0 : index
    %10 = vector.load %arg4[%c0_6, %c0_7] : memref<128x128xbf16, #tpu.memory_space<vmem>>, vector<128x128xbf16>
    %cst = arith.constant dense<0.000000e+00> : vector<16x128xf32>
    %11 = tpu.matmul %3, %10, %cst {dimension_numbers = #tpu.dot_dimension_numbers<[1], [1], [0], [0], [0, 0, 1, 0], [], []>} : vector<16x128xbf16>, vector<128x128xbf16>, vector<16x128xf32> -> vector<16x128xf32>
    %c0_8 = arith.constant 0 : index
    %c0_9 = arith.constant 0 : index
    %12 = vector.load %arg7[%c0_8, %c0_9] : memref<1x128xf32, #tpu.memory_space<vmem>>, vector<1x128xf32>
    %c0_10 = arith.constant 0 : index
    %c0_11 = arith.constant 0 : index
    %13 = vector.load %arg5[%c0_10, %c0_11] : memref<128x128xbf16, #tpu.memory_space<vmem>>, vector<128x128xbf16>
    %cst_12 = arith.constant dense<0.000000e+00> : vector<16x128xf32>
    %14 = tpu.matmul %8, %13, %cst_12 {dimension_numbers = #tpu.dot_dimension_numbers<[1], [1], [0], [0], [0, 0, 1, 0], [], []>} : vector<16x128xbf16>, vector<128x128xbf16>, vector<16x128xf32> -> vector<16x128xf32>
    %15 = vector.broadcast %12 : vector<1x128xf32> to vector<16x128xf32>
    %16 = arith.mulf %15, %14 : vector<16x128xf32>
    %17 = arith.addf %11, %16 : vector<16x128xf32>
    %18 = arith.addf %9, %17 : vector<16x128xf32>
    %c0_13 = arith.constant 0 : index
    %c0_14 = arith.constant 0 : index
    %19 = vector.load %arg10[%c0_13, %c0_14] : memref<16x128xf32, #tpu.memory_space<vmem>>, vector<16x128xf32>
    tpu.vector_store %arg10[%c0_13, %c0_14], %18 {strides = array<i32>} : memref<16x128xf32, #tpu.memory_space<vmem>>, vector<16x128xf32>,
    %c0_i32_15 = arith.constant 0 : i32
    %20 = arith.cmpi eq, %arg2, %c0_i32_15 : i32
    %21 = arith.extui %20 : i1 to i32
    %c0_i32_16 = arith.constant 0 : i32
    %22 = arith.cmpi ne, %21, %c0_i32_16 : i32
    scf.if %22 {
      %c0_17 = arith.constant 0 : index
      %c0_18 = arith.constant 0 : index
      %23 = vector.load %arg10[%c0_17, %c0_18] : memref<16x128xf32, #tpu.memory_space<vmem>>, vector<16x128xf32>
      %c0_19 = arith.constant 0 : index
      %c0_20 = arith.constant 0 : index
      %24 = vector.load %arg8[%c0_19, %c0_20] : memref<1x128xf32, #tpu.memory_space<vmem>>, vector<1x128xf32>
      %25 = vector.broadcast %24 : vector<1x128xf32> to vector<16x128xf32>
      %26 = arith.addf %23, %25 : vector<16x128xf32>
      %c0_21 = arith.constant 0 : index
      %c0_22 = arith.constant 0 : index
      %27 = vector.load %arg9[%c0_21, %c0_22] : memref<16x128xf32, #tpu.memory_space<vmem>>, vector<16x128xf32>
      tpu.vector_store %arg9[%c0_21, %c0_22], %26 {strides = array<i32>} : memref<16x128xf32, #tpu.memory_space<vmem>>, vector<16x128xf32>,
    } else {
    }
    return
  }
  func.func @transform_0(%arg0: i32, %arg1: i32, %arg2: i32) -> (i32, i32) {
    %c0_i32 = arith.constant 0 : i32
    return %arg0, %arg2 : i32, i32
  }
  func.func @transform_1(%arg0: i32, %arg1: i32, %arg2: i32) -> (i32, i32) {
    %c0_i32 = arith.constant 0 : i32
    return %arg1, %arg2 : i32, i32
  }
  func.func @transform_2(%arg0: i32, %arg1: i32, %arg2: i32) -> (i32, i32) {
    %c0_i32 = arith.constant 0 : i32
    return %arg1, %arg2 : i32, i32
  }
  func.func @transform_3(%arg0: i32, %arg1: i32, %arg2: i32) -> (i32, i32) {
    %c0_i32 = arith.constant 0 : i32
    %c0_i32_0 = arith.constant 0 : i32
    return %c0_i32, %arg2 : i32, i32
  }
  func.func @transform_4(%arg0: i32, %arg1: i32, %arg2: i32) -> (i32, i32) {
    %c0_i32 = arith.constant 0 : i32
    %c0_i32_0 = arith.constant 0 : i32
    return %c0_i32, %arg1 : i32, i32
  }
  func.func @transform_5(%arg0: i32, %arg1: i32, %arg2: i32) -> (i32, i32) {
    %c0_i32 = arith.constant 0 : i32
    %c0_i32_0 = arith.constant 0 : i32
    return %c0_i32, %arg1 : i32, i32
  }
  func.func @transform_6(%arg0: i32, %arg1: i32, %arg2: i32) -> (i32, i32) {
    %c0_i32 = arith.constant 0 : i32
    return %arg0, %arg1 : i32, i32
  }
}

</mosaic_0001>

<bundles_post_ra>
// kernel: tpu_custom_call.1
= control target key start
LH: loop header
LB: loop body
LE: loop exit
PB: predicated region body
PF: predicated region fallthrough
CT: control target
= control target key end

     0   :  { %11 = vsyncpa [#allocation4], 0  ;;  %s669_s0 = inlined_call_operand.hbm [shape: bf16[16,128], index: 0, kind: input, shape index: {}]   ;;  %s670_s1 = inlined_call_operand.hbm [shape: bf16[128,128], index: 1, kind: input, shape index: {}]   ;;  %s671_s2 = inlined_call_operand.hbm [shape: bf16[128,128], index: 2, kind: input, shape index: {}]   ;;  %s672_s3 = inlined_call_operand.vmem [shape: f32[1,128], index: 3, kind: input, shape index: {}]   ;;  %s673_s4 = inlined_call_operand.vmem [shape: f32[1,128], index: 4, kind: input, shape index: {}]   ;;  %s674_s5 = inlined_call_operand.vmem [shape: f32[1,128], index: 5, kind: input, shape index: {}]   ;;  %s675_s6 = inlined_call_operand.hbm [shape: f32[16,128], index: 6, kind: output, shape index: {}]  }
   0x1   :  { %12 = vsyncpa [#allocation7], 0 }
   0x2   :  { %13 = vsyncpa [#allocation5], 0  ;;  %s551_s21 = smov [#allocation6]   ;;  %s552_s23 = smov [#allocation3]  }
   0x3   :  { %s31_s22 = sshll.u32 %s551_s21, 4  ;;  %s19_s24 = sshll.u32 %s552_s23, 4  ;;  %s32_s22 = int_to_ptr.vmem [resolvable:$true] %s31_s22  ;;  %s596_s24 = int_to_ptr.vmem [resolvable:$true] %s19_s24 }
   0x4   :  { %s457_s27 = scalar_lea.hbm %s670_s1, 1024 }
   0x5   :  { %p458_p0 = scmp.ne.s32.totalorder %s670_s1, %s457_s27  ;;  %p461_p1 = scmp.lt.u32.totalorder %s457_s27, %s670_s1 }
   0x7   :  { %p463_p2 = pnand %p461_p1, %p458_p0 }
   0x9   :  { %466 = shalt.err (!%p463_p2)
}
   0xa   :  { %s467_s8 = scalar_lea.vmem %s32_s22, 1024  ;;  %p472_p4 = scmp.lt.s32.totalorder %s32_s22, %s32_s22 }
   0xb   :  { %p468_p3 = scmp.ne.s32.totalorder %s32_s22, %s467_s8  ;;  %p473_p5 = scmp.lt.s32.totalorder %s467_s8, %s467_s8 }
   0xd   :  { %p474_p6 = por %p473_p5, %p472_p4 }
   0xf   :  { %p475_p7 = pnand %p474_p6, %p468_p3 }
  0x11   :  { %478 = shalt.err (!%p475_p7)
}
  0x12   :  { %s553_s9 = smov 64   ;;  %s554_s10 = smov 4  }
  0x13   :  { %37 = dma.hbm_to_vmem [thread:$0]  %s670_s1, 1024, %s32_s22, [#allocation7], %s553_s9, %s553_s9, %s554_s10  }
  0x14   :  { %s479_s15 = scalar_lea.hbm %s669_s0, 128 }
  0x15   :  { %p480_p8 = scmp.ne.s32.totalorder %s669_s0, %s479_s15  ;;  %p483_p9 = scmp.lt.u32.totalorder %s479_s15, %s669_s0 }
  0x17   :  { %p485_p10 = pnand %p483_p9, %p480_p8 }
  0x19   :  { %488 = shalt.err (!%p485_p10)
}
  0x1a   :  { %s489_s20 = scalar_lea.vmem %s596_s24, 128  ;;  %p494_p12 = scmp.lt.s32.totalorder %s596_s24, %s596_s24 }
  0x1b   :  { %p490_p11 = scmp.ne.s32.totalorder %s596_s24, %s489_s20  ;;  %p495_p13 = scmp.lt.s32.totalorder %s489_s20, %s489_s20 }
  0x1d   :  { %p496_p0 = por %p495_p13, %p494_p12 }
  0x1f   :  { %p497_p1 = pnand %p496_p0, %p490_p11 }
  0x21   :  { %500 = shalt.err (!%p497_p1)
}
  0x22   :  { %25 = dma.hbm_to_vmem [thread:$0]  %s669_s0, 128, %s596_s24, [#allocation4], %s553_s9, %s553_s9, %s554_s10  }
  0x23   :  { %s555_s22 = smov [#allocation8]   ;;  %s501_s27 = scalar_lea.hbm %s671_s2, 1024 }
  0x24   :  { %s43_s23 = sshll.u32 %s555_s22, 4  ;;  %p502_p2 = scmp.ne.s32.totalorder %s671_s2, %s501_s27  ;;  %s44_s23 = int_to_ptr.vmem [resolvable:$true] %s43_s23 }
  0x25   :  { %p505_p3 = scmp.lt.u32.totalorder %s501_s27, %s671_s2 }
  0x27   :  { %p507_p4 = pnand %p505_p3, %p502_p2 }
  0x29   :  { %510 = shalt.err (!%p507_p4)
}
  0x2a   :  { %s511_s8 = scalar_lea.vmem %s44_s23, 1024  ;;  %p516_p6 = scmp.lt.s32.totalorder %s44_s23, %s44_s23 }
  0x2b   :  { %p512_p5 = scmp.ne.s32.totalorder %s44_s23, %s511_s8  ;;  %p517_p7 = scmp.lt.s32.totalorder %s511_s8, %s511_s8 }
  0x2d   :  { %p518_p8 = por %p517_p7, %p516_p6 }
  0x2f   :  { %p519_p9 = pnand %p518_p8, %p512_p5 }
  0x31   :  { %522 = shalt.err (!%p519_p9)
}
  0x32   :  { %49 = dma.hbm_to_vmem [thread:$0]  %s671_s2, 1024, %s44_s23, [#allocation7], %s553_s9, %s553_s9, %s554_s10  }
  0x33   :  { %545 = dma.done.wait [#allocation4], 128  }
  0x34   :  { %546 = vsyncadd [#allocation4], 4294967168 }
  0x35   :  { %547 = dma.done.wait [#allocation7], 2048  }
  0x36   :  { %548 = vsyncadd [#allocation7], 4294965248  ;;  %v556_v0 = vmov 0.0   ;;  %vm557_vm0 = vmmov 0   ;;  %v439_v1 = vld [vmem:[#allocation8] sm:$0xff]   ;;  %v441_v3 = vld [vmem:[#allocation8 + $0x8] sm:$0xff]  }
  0x37   :  { %389 = vmatprep.subr.bf16.mxu0 %v556_v0  ;;  %409 = vmatprep.subr.bf16.mxu1 %v556_v0  ;;  %v440_v2 = vld [vmem:[#allocation6] sm:$0xff]   ;;  %v442_v4 = vld [vmem:[#allocation6 + $0x8] sm:$0xff]   ;;  %v443_v5 = vld [vmem:[#allocation8 + $0x10] sm:$0xff]  }
  0x38   :  { %405 = vmatprep.mubr.msk.bf16.mxu0 %vm557_vm0, %v556_v0  ;;  %425 = vmatprep.mubr.msk.bf16.mxu1 %vm557_vm0, %v556_v0  ;;  %v444_v6 = vld [vmem:[#allocation6 + $0x10] sm:$0xff]   ;;  %v445_v7 = vld [vmem:[#allocation8 + $0x18] sm:$0xff]   ;;  %v447_v9 = vld [vmem:[#allocation8 + $0x20] sm:$0xff]  }
  0x39   :  { %390 = vmatpush3.bf16.xpose.msra.mxu0 %v439_v1  ;;  %410 = vmatpush3.bf16.xpose.msra.mxu1 %v440_v2  ;;  %v446_v8 = vld [vmem:[#allocation6 + $0x18] sm:$0xff]   ;;  %v448_v10 = vld [vmem:[#allocation6 + $0x20] sm:$0xff]   ;;  %v449_v11 = vld [vmem:[#allocation8 + $0x28] sm:$0xff]  }
  0x3a   :  { %391 = vmatprep.subr.bf16.mxu0 %v556_v0  ;;  %411 = vmatprep.subr.bf16.mxu1 %v556_v0  ;;  %v450_v12 = vld [vmem:[#allocation6 + $0x28] sm:$0xff]   ;;  %v451_v13 = vld [vmem:[#allocation8 + $0x30] sm:$0xff]   ;;  %v72_v15 = vld [vmem:[#allocation3] sm:$0xff]  }
  0x3b   :  { %v452_v14 = vld [vmem:[#allocation6 + $0x30] sm:$0xff]   ;;  %v74_v16 = vunpack.c.l.bf16 %v72_v15  ;;  %v75_v17 = vunpack.c.h.bf16 %v72_v15  ;;  %v453_v18 = vld [vmem:[#allocation8 + $0x38] sm:$0xff]  }
  0x3c   :  { %v351_v19 = vld [vmem:[%s672_s3] ss:$0 sm:$0xff]  ;;  %s558_s3 = smov [#allocation9]  }
  0x3d   :  { %v454_v20 = vld [vmem:[#allocation6 + $0x38] sm:$0xff]   ;;  %v83_v21 = vmul.f32 %v351_v19, %v74_v16  ;;  %v84_v22 = vmul.f32 %v351_v19, %v75_v17  ;;  %s338_s14 = sshll.u32 %s558_s3, 4  ;;  %s339_s14 = int_to_ptr.vmem [resolvable:$true] %s338_s14 }
  0x3e   :  { %v360_v24 = vld [vmem:[%s673_s4] ss:$0 sm:$0xff]  ;;  %s523_s4 = scalar_lea.vmem %s339_s14, 256  ;;  %p528_p11 = scmp.lt.s32.totalorder %s339_s14, %s339_s14 }
  0x3f   :  { %v85_v23 = vpack.c.bf16 %v84_v22, %v83_v21  ;;  %v370_v29 = vld [vmem:[%s674_s5] ss:$0 sm:$0xff]  ;;  %p524_p10 = scmp.ne.s32.totalorder %s339_s14, %s523_s4  ;;  %p529_p12 = scmp.lt.s32.totalorder %s523_s4, %s523_s4 }
  0x41   :  { %392 = vmatpush3.bf16.xpose.msra.mxu0 %v441_v3  ;;  %412 = vmatpush3.bf16.xpose.msra.mxu1 %v442_v4  ;;  %p530_p13 = por %p529_p12, %p528_p11 }
  0x42   :  { %393 = vmatprep.subr.bf16.mxu0 %v556_v0  ;;  %413 = vmatprep.subr.bf16.mxu1 %v556_v0 }
  0x43   :  { %p531_p0 = pnand %p530_p13, %p524_p10 }
  0x49   :  { %394 = vmatpush3.bf16.xpose.msra.mxu0 %v443_v5  ;;  %414 = vmatpush3.bf16.xpose.msra.mxu1 %v444_v6 }
  0x4a   :  { %395 = vmatprep.subr.bf16.mxu0 %v556_v0  ;;  %415 = vmatprep.subr.bf16.mxu1 %v556_v0 }
  0x51   :  { %396 = vmatpush3.bf16.xpose.msra.mxu0 %v445_v7  ;;  %416 = vmatpush3.bf16.xpose.msra.mxu1 %v446_v8 }
  0x52   :  { %397 = vmatprep.subr.bf16.mxu0 %v556_v0  ;;  %417 = vmatprep.subr.bf16.mxu1 %v556_v0 }
  0x59   :  { %398 = vmatpush3.bf16.xpose.msra.mxu0 %v447_v9  ;;  %418 = vmatpush3.bf16.xpose.msra.mxu1 %v448_v10 }
  0x5a   :  { %399 = vmatprep.subr.bf16.mxu0 %v556_v0  ;;  %419 = vmatprep.subr.bf16.mxu1 %v556_v0 }
  0x61   :  { %400 = vmatpush3.bf16.xpose.msra.mxu0 %v449_v11  ;;  %420 = vmatpush3.bf16.xpose.msra.mxu1 %v450_v12 }
  0x62   :  { %401 = vmatprep.subr.bf16.mxu0 %v556_v0  ;;  %421 = vmatprep.subr.bf16.mxu1 %v556_v0 }
  0x69   :  { %402 = vmatpush3.bf16.xpose.msra.mxu0 %v451_v13  ;;  %422 = vmatpush3.bf16.xpose.msra.mxu1 %v452_v14 }
  0x6a   :  { %403 = vmatprep.subr.bf16.mxu0 %v556_v0  ;;  %423 = vmatprep.subr.bf16.mxu1 %v556_v0 }
  0x71   :  { %404 = vmatpush3.bf16.xpose.msra.mxu0 %v453_v18  ;;  %424 = vmatpush3.bf16.xpose.msra.mxu1 %v454_v20 }
  0x78   :  { %406 = vmatmul.mubr.bf16.vlgmr.msra.gmra.mrb[0].mxu0 %v85_v23  ;;  %426 = vmatmul.mubr.bf16.vlgmr.msra.gmra.mrb[0].mxu1 %v72_v15 }
 0x14b   :  { %v203_v25 = vpop.f32.mrb[0].mxu0  ;;  %v306_v27 = vpop.f32.mrb[0].mxu1 }
 0x14c   :  { %v216_v26 = vmul.f32 %v360_v24, %v203_v25  ;;  %v407_v28 = vpop.f32.mrb[1].mxu0  ;;  %v427_v30 = vpop.f32.mrb[1].mxu1 }
 0x14d   :  { %v206_v31 = vpop.f32.mrb[2].mxu0  ;;  %v309_v34 = vpop.f32.mrb[2].mxu1 }
 0x14e   :  { %v307_v32 = vadd.f32 %v306_v27, %v216_v26  ;;  %v217_v33 = vmul.f32 %v360_v24, %v206_v31  ;;  %v408_v35 = vpop.f32.mrb[3].mxu0  ;;  %v428_v36 = vpop.f32.mrb[3].mxu1 }
 0x150   :  { %v329_v37 = vadd.f32 %v370_v29, %v307_v32  ;;  %v310_v38 = vadd.f32 %v309_v34, %v217_v33 }
 0x152   :  { %331 = vst [vmem:[#allocation9] sm:$0xff] %v329_v37  ;;  %v330_v39 = vadd.f32 %v370_v29, %v310_v38 }
 0x154   :  { %332 = vst [vmem:[#allocation9 + $0x8] sm:$0xff] %v330_v39 }
 0x155   :  { %534 = shalt.err (!%p531_p0)
}
 0x156   :  { %s535_s16 = scalar_lea.hbm %s675_s6, 256 }
 0x157   :  { %p536_p1 = scmp.ne.s32.totalorder %s675_s6, %s535_s16  ;;  %p539_p2 = scmp.lt.u32.totalorder %s535_s16, %s675_s6 }
 0x159   :  { %p541_p3 = pnand %p539_p2, %p536_p1 }
 0x15b   :  { %544 = shalt.err (!%p541_p3)
}
 0x15c   :  { %s559_s1 = smov 128   ;;  %s560_s21 = smov 8  }
 0x15d   :  { %344 = dma.vmem_to_hbm [thread:$0]  %s339_s14, 256, %s675_s6, [#allocation5], %s559_s1, %s559_s1, %s560_s21  }
 0x15e   :  { %549 = dma.done.wait [#allocation5], 256  }
 0x15f   :  { %550 = vsyncadd [#allocation5], 4294967040 }
 0x160   :  { %348 = vsyncpa [#allocation4], 1 }
 0x161   :  { %349 = vsyncpa [#allocation7], 1 }
 0x162   :  { %350 = vsyncpa [#allocation5], 1 }

</bundles_post_ra>
